<compile_context>
chip_gen: v6e
topology: v6e:2x2x1
jax: 0.10.0
libtpu: 0.0.40
codegen_flags: <defaults>
</compile_context>

<pallas_src>
import numpy as np
import jax
import jax.numpy as jnp
from jax.experimental import pallas as pl
from jax.experimental.pallas import tpu as pltpu


# ---------------------------------------------------------------------------
# Pallas kernel: 4x (Linear -> bias -> ReLU).  Matmuls run on the MXU in the
# weights' dtype (bf16 or f32) with f32 accumulation; elementwise in f32 (VPU).
# ---------------------------------------------------------------------------
def block_kernel(x_ref, w1_ref, w2_ref, w3_ref, w4_ref, b_ref, o_ref):
    f32 = jnp.float32
    mm_dtype = w2_ref.dtype          # bf16 (or f32) — MXU input dtype
    b = b_ref[...]                   # (4, Upad) f32, stacked biases

    h = jnp.dot(x_ref[...], w1_ref[...], preferred_element_type=f32)
    h = jnp.maximum(h + b[0:1, :], 0.0)

    h = jnp.dot(h.astype(mm_dtype), w2_ref[...], preferred_element_type=f32)
    h = jnp.maximum(h + b[1:2, :], 0.0)

    h = jnp.dot(h.astype(mm_dtype), w3_ref[...], preferred_element_type=f32)
    h = jnp.maximum(h + b[2:3, :], 0.0)

    h = jnp.dot(h.astype(mm_dtype), w4_ref[...], preferred_element_type=f32)
    o_ref[...] = jnp.maximum(h + b[3:4, :], 0.0).astype(o_ref.dtype)


# ---------------------------------------------------------------------------
# Host-side wrapper.
# ---------------------------------------------------------------------------
def _round_up(n, m):
    return (n + m - 1) // m * m


def _pad_to(a, rows, cols):
    pr, pc = rows - a.shape[0], cols - a.shape[1]
    if pr == 0 and pc == 0:
        return a
    return jnp.pad(a, ((0, pr), (0, pc)))


def block_forward(x, params, *, use_bf16=True):
    """x: (B, past_seq_len) f32.  Returns hidden activation (B, units) f32."""
    B, P = x.shape
    U = params["w1"].shape[1]
    Upad = _round_up(max(U, 128), 128)          # lane-dense output width

    mm_dtype = jnp.bfloat16 if use_bf16 else jnp.float32

    # Pre-transposed (in, out) weights, zero-padded to lane-dense widths.
    w1p = _pad_to(params["w1"], P, Upad).astype(mm_dtype)       # (P,    Upad)
    w2p = _pad_to(params["w2"], Upad, Upad).astype(mm_dtype)    # (Upad, Upad)
    w3p = _pad_to(params["w3"], Upad, Upad).astype(mm_dtype)    # (Upad, Upad)
    w4p = _pad_to(params["w4"], Upad, Upad).astype(mm_dtype)    # (Upad, Upad)
    # Stacked biases, kept in f32 (bias-add / ReLU run on the VPU in f32).
    bstack = jnp.concatenate(
        [_pad_to(params[k], 1, Upad) for k in ("b1", "b2", "b3", "b4")], axis=0
    ).astype(jnp.float32)                                       # (4, Upad)

    # Batch tiling: one grid step for small/medium batches (padded to a
    # sublane-dense multiple of 16, which covers both f32 8-row and bf16
    # 16-row tiles); 256-row tiles for large batches (>=2 grid steps lets
    # v7x shard across both TensorCores).
    if B <= 256:
        Bpad = _round_up(max(B, 16), 16)
        batch_tile = Bpad
    else:
        batch_tile = 256
        Bpad = _round_up(B, batch_tile)
    x_p = x if Bpad == B else jnp.pad(x, ((0, Bpad - B), (0, 0)))
    x_p = x_p.astype(mm_dtype)

    full2d = lambda shape: pl.BlockSpec(shape, lambda i: (0, 0))

    grid_spec = pltpu.PrefetchScalarGridSpec(
        num_scalar_prefetch=0,
        grid=(Bpad // batch_tile,),
        in_specs=[
            pl.BlockSpec((batch_tile, P), lambda i: (i, 0)),   # x tile
            full2d((P, Upad)),                                 # fc1 weight
            full2d((Upad, Upad)),                              # fc2 weight
            full2d((Upad, Upad)),                              # fc3 weight
            full2d((Upad, Upad)),                              # fc4 weight
            full2d((4, Upad)),                                 # stacked biases
        ],
        out_specs=pl.BlockSpec((batch_tile, Upad), lambda i: (i, 0)),
    )

    fn = pl.pallas_call(
        block_kernel,
        out_shape=jax.ShapeDtypeStruct((Bpad, Upad), jnp.float32),
        grid_spec=grid_spec,
        compiler_params=pltpu.CompilerParams(
            dimension_semantics=("parallel",)),
    )
    out = fn(x_p, w1p, w2p, w3p, w4p, bstack)
    return out[:B, :U]


# ---------------------------------------------------------------------------
# Deterministic parameter init (shapes from Block.__init__; stored (in, out)).
# ---------------------------------------------------------------------------
def init_params(key, units, past_seq_len):
    ks = jax.random.split(key, 8)
    scale = 0.1
    return {
        "w1": jax.random.normal(ks[0], (past_seq_len, units), jnp.float32) * scale,
        "b1": jax.random.normal(ks[1], (1, units), jnp.float32) * scale,
        "w2": jax.random.normal(ks[2], (units, units), jnp.float32) * scale,
        "b2": jax.random.normal(ks[3], (1, units), jnp.float32) * scale,
        "w3": jax.random.normal(ks[4], (units, units), jnp.float32) * scale,
        "b3": jax.random.normal(ks[5], (1, units), jnp.float32) * scale,
        "w4": jax.random.normal(ks[6], (units, units), jnp.float32) * scale,
        "b4": jax.random.normal(ks[7], (1, units), jnp.float32) * scale,
    }


def reference_forward(x, params, *, use_bf16=True):
    """Pure-JAX reference replicating the same bf16-input / f32-accum math."""
    cdt = jnp.bfloat16 if use_bf16 else jnp.float32
    h = x
    for wk, bk in (("w1", "b1"), ("w2", "b2"), ("w3", "b3"), ("w4", "b4")):
        h = jnp.dot(h.astype(cdt), params[wk].astype(cdt),
                    preferred_element_type=jnp.float32)
        h = jnp.maximum(h + params[bk], 0.0)
    return h


if __name__ == "__main__":
    # Small shapes consistent with the module defaults.
    batch = 16
    units = 32
    past_seq_len = 10
    # future_seq_len / thetas_dim are constructor args only; Block.forward
    # does not use theta_b_fc / theta_f_fc or the linspaces.

    key = jax.random.PRNGKey(0)
    kx, kp = jax.random.split(key)
    x = jax.random.normal(kx, (batch, past_seq_len), jnp.float32)
    params = init_params(kp, units, past_seq_len)

    out = block_forward(x, params, use_bf16=True)
    jax.block_until_ready(out)

    ref = reference_forward(x, params, use_bf16=True)
    assert out.shape == (batch, units)
    np.testing.assert_allclose(np.asarray(out), np.asarray(ref),
                               rtol=1e-2, atol=1e-2)

    print("KERNEL_OK")
</pallas_src>

<mosaic_0001>
module attributes {stable_mosaic.version = 11 : i64} {
  func.func @block_kernel(%arg0: i32, %arg1: memref<16x10xbf16, #tpu.memory_space<vmem>>, %arg2: memref<10x128xbf16, #tpu.memory_space<vmem>>, %arg3: memref<128x128xbf16, #tpu.memory_space<vmem>>, %arg4: memref<128x128xbf16, #tpu.memory_space<vmem>>, %arg5: memref<128x128xbf16, #tpu.memory_space<vmem>>, %arg6: memref<4x128xf32, #tpu.memory_space<vmem>>, %arg7: memref<16x128xf32, #tpu.memory_space<vmem>>) attributes {dimension_semantics = [#tpu.dimension_semantics<parallel>], iteration_bounds = array<i64: 1>, scalar_prefetch = 0 : i64, scratch_operands = 0 : i64, tpu.core_type = #tpu.core_type<tc>, window_params = [{transform_indices = @transform_0, window_bounds = array<i64: 16, 10>}, {pipeline_mode = #tpu.pipeline_mode<synchronous>, transform_indices = @transform_1, window_bounds = array<i64: 10, 128>}, {pipeline_mode = #tpu.pipeline_mode<synchronous>, transform_indices = @transform_2, window_bounds = array<i64: 128, 128>}, {pipeline_mode = #tpu.pipeline_mode<synchronous>, transform_indices = @transform_3, window_bounds = array<i64: 128, 128>}, {pipeline_mode = #tpu.pipeline_mode<synchronous>, transform_indices = @transform_4, window_bounds = array<i64: 128, 128>}, {pipeline_mode = #tpu.pipeline_mode<synchronous>, transform_indices = @transform_5, window_bounds = array<i64: 4, 128>}, {transform_indices = @transform_6, window_bounds = array<i64: 16, 128>}]} {
    %c0 = arith.constant 0 : index
    %c0_0 = arith.constant 0 : index
    %0 = vector.load %arg6[%c0, %c0_0] : memref<4x128xf32, #tpu.memory_space<vmem>>, vector<4x128xf32>
    %c0_1 = arith.constant 0 : index
    %c0_2 = arith.constant 0 : index
    %1 = vector.load %arg1[%c0_1, %c0_2] : memref<16x10xbf16, #tpu.memory_space<vmem>>, vector<16x10xbf16>
    %c0_3 = arith.constant 0 : index
    %c0_4 = arith.constant 0 : index
    %2 = vector.load %arg2[%c0_3, %c0_4] : memref<10x128xbf16, #tpu.memory_space<vmem>>, vector<10x128xbf16>
    %cst = arith.constant dense<0.000000e+00> : vector<16x128xf32>
    %3 = tpu.matmul %1, %2, %cst {dimension_numbers = #tpu.dot_dimension_numbers<[1], [0], [0], [1], [0, 0, 1, 1], [], []>} : vector<16x10xbf16>, vector<10x128xbf16>, vector<16x128xf32> -> vector<16x128xf32>
    %4 = vector.extract_strided_slice %0 {offsets = [0, 0], sizes = [1, 128], strides = [1, 1]} : vector<4x128xf32> to vector<1x128xf32>
    %5 = vector.broadcast %4 : vector<1x128xf32> to vector<16x128xf32>
    %6 = arith.addf %3, %5 : vector<16x128xf32>
    %cst_5 = arith.constant 0.000000e+00 : f32
    %7 = vector.broadcast %cst_5 : f32 to vector<16x128xf32>
    %8 = arith.maximumf %6, %7 : vector<16x128xf32>
    %9 = arith.truncf %8 : vector<16x128xf32> to vector<16x128xbf16>
    %c0_6 = arith.constant 0 : index
    %c0_7 = arith.constant 0 : index
    %10 = vector.load %arg3[%c0_6, %c0_7] : memref<128x128xbf16, #tpu.memory_space<vmem>>, vector<128x128xbf16>
    %cst_8 = arith.constant dense<0.000000e+00> : vector<16x128xf32>
    %11 = tpu.matmul %9, %10, %cst_8 {dimension_numbers = #tpu.dot_dimension_numbers<[1], [0], [0], [1], [0, 0, 1, 1], [], []>} : vector<16x128xbf16>, vector<128x128xbf16>, vector<16x128xf32> -> vector<16x128xf32>
    %12 = vector.extract_strided_slice %0 {offsets = [1, 0], sizes = [1, 128], strides = [1, 1]} : vector<4x128xf32> to vector<1x128xf32>
    %13 = vector.broadcast %12 : vector<1x128xf32> to vector<16x128xf32>
    %14 = arith.addf %11, %13 : vector<16x128xf32>
    %cst_9 = arith.constant 0.000000e+00 : f32
    %15 = vector.broadcast %cst_9 : f32 to vector<16x128xf32>
    %16 = arith.maximumf %14, %15 : vector<16x128xf32>
    %17 = arith.truncf %16 : vector<16x128xf32> to vector<16x128xbf16>
    %c0_10 = arith.constant 0 : index
    %c0_11 = arith.constant 0 : index
    %18 = vector.load %arg4[%c0_10, %c0_11] : memref<128x128xbf16, #tpu.memory_space<vmem>>, vector<128x128xbf16>
    %cst_12 = arith.constant dense<0.000000e+00> : vector<16x128xf32>
    %19 = tpu.matmul %17, %18, %cst_12 {dimension_numbers = #tpu.dot_dimension_numbers<[1], [0], [0], [1], [0, 0, 1, 1], [], []>} : vector<16x128xbf16>, vector<128x128xbf16>, vector<16x128xf32> -> vector<16x128xf32>
    %20 = vector.extract_strided_slice %0 {offsets = [2, 0], sizes = [1, 128], strides = [1, 1]} : vector<4x128xf32> to vector<1x128xf32>
    %21 = vector.broadcast %20 : vector<1x128xf32> to vector<16x128xf32>
    %22 = arith.addf %19, %21 : vector<16x128xf32>
    %cst_13 = arith.constant 0.000000e+00 : f32
    %23 = vector.broadcast %cst_13 : f32 to vector<16x128xf32>
    %24 = arith.maximumf %22, %23 : vector<16x128xf32>
    %25 = arith.truncf %24 : vector<16x128xf32> to vector<16x128xbf16>
    %c0_14 = arith.constant 0 : index
    %c0_15 = arith.constant 0 : index
    %26 = vector.load %arg5[%c0_14, %c0_15] : memref<128x128xbf16, #tpu.memory_space<vmem>>, vector<128x128xbf16>
    %cst_16 = arith.constant dense<0.000000e+00> : vector<16x128xf32>
    %27 = tpu.matmul %25, %26, %cst_16 {dimension_numbers = #tpu.dot_dimension_numbers<[1], [0], [0], [1], [0, 0, 1, 1], [], []>} : vector<16x128xbf16>, vector<128x128xbf16>, vector<16x128xf32> -> vector<16x128xf32>
    %28 = vector.extract_strided_slice %0 {offsets = [3, 0], sizes = [1, 128], strides = [1, 1]} : vector<4x128xf32> to vector<1x128xf32>
    %29 = vector.broadcast %28 : vector<1x128xf32> to vector<16x128xf32>
    %30 = arith.addf %27, %29 : vector<16x128xf32>
    %cst_17 = arith.constant 0.000000e+00 : f32
    %31 = vector.broadcast %cst_17 : f32 to vector<16x128xf32>
    %32 = arith.maximumf %30, %31 : vector<16x128xf32>
    %c0_18 = arith.constant 0 : index
    %c0_19 = arith.constant 0 : index
    %33 = vector.load %arg7[%c0_18, %c0_19] : memref<16x128xf32, #tpu.memory_space<vmem>>, vector<16x128xf32>
    tpu.vector_store %arg7[%c0_18, %c0_19], %32 {strides = array<i32>} : memref<16x128xf32, #tpu.memory_space<vmem>>, vector<16x128xf32>,
    return
  }
  func.func @transform_0(%arg0: i32) -> (i32, i32) {
    %c0_i32 = arith.constant 0 : i32
    %c0_i32_0 = arith.constant 0 : i32
    return %arg0, %c0_i32 : i32, i32
  }
  func.func @transform_1(%arg0: i32) -> (i32, i32) {
    %c0_i32 = arith.constant 0 : i32
    %c0_i32_0 = arith.constant 0 : i32
    %c0_i32_1 = arith.constant 0 : i32
    return %c0_i32, %c0_i32_0 : i32, i32
  }
  func.func @transform_2(%arg0: i32) -> (i32, i32) {
    %c0_i32 = arith.constant 0 : i32
    %c0_i32_0 = arith.constant 0 : i32
    %c0_i32_1 = arith.constant 0 : i32
    return %c0_i32, %c0_i32_0 : i32, i32
  }
  func.func @transform_3(%arg0: i32) -> (i32, i32) {
    %c0_i32 = arith.constant 0 : i32
    %c0_i32_0 = arith.constant 0 : i32
    %c0_i32_1 = arith.constant 0 : i32
    return %c0_i32, %c0_i32_0 : i32, i32
  }
  func.func @transform_4(%arg0: i32) -> (i32, i32) {
    %c0_i32 = arith.constant 0 : i32
    %c0_i32_0 = arith.constant 0 : i32
    %c0_i32_1 = arith.constant 0 : i32
    return %c0_i32, %c0_i32_0 : i32, i32
  }
  func.func @transform_5(%arg0: i32) -> (i32, i32) {
    %c0_i32 = arith.constant 0 : i32
    %c0_i32_0 = arith.constant 0 : i32
    %c0_i32_1 = arith.constant 0 : i32
    return %c0_i32, %c0_i32_0 : i32, i32
  }
  func.func @transform_6(%arg0: i32) -> (i32, i32) {
    %c0_i32 = arith.constant 0 : i32
    %c0_i32_0 = arith.constant 0 : i32
    return %arg0, %c0_i32 : i32, i32
  }
}

</mosaic_0001>

<bundles_post_ra>
// kernel: tpu_custom_call.1
= control target key start
LH: loop header
LB: loop body
LE: loop exit
PB: predicated region body
PF: predicated region fallthrough
CT: control target
= control target key end

     0   :  { %11 = vsyncpa [#allocation3], 0  ;;  %s936_s0 = inlined_call_operand.hbm [shape: bf16[16,10], index: 0, kind: input, shape index: {}]   ;;  %s937_s1 = inlined_call_operand.hbm [shape: bf16[10,128], index: 1, kind: input, shape index: {}]   ;;  %s938_s2 = inlined_call_operand.hbm [shape: bf16[128,128], index: 2, kind: input, shape index: {}]   ;;  %s939_s3 = inlined_call_operand.hbm [shape: bf16[128,128], index: 3, kind: input, shape index: {}]   ;;  %s940_s4 = inlined_call_operand.hbm [shape: bf16[128,128], index: 4, kind: input, shape index: {}]   ;;  %s941_s5 = inlined_call_operand.vmem [shape: f32[4,128], index: 5, kind: input, shape index: {}]   ;;  %s942_s6 = inlined_call_operand.hbm [shape: f32[16,128], index: 6, kind: output, shape index: {}]  }
   0x1   :  { %12 = vsyncpa [#allocation6], 0 }
   0x2   :  { %13 = vsyncpa [#allocation9], 0 }
   0x3   :  { %14 = vsyncpa [#allocation4], 0  ;;  %s808_s21 = smov [#allocation5]   ;;  %s809_s23 = smov [#allocation8]  }
   0x4   :  { %s32_s22 = sshll.u32 %s808_s21, 4  ;;  %s56_s24 = sshll.u32 %s809_s23, 4  ;;  %s33_s22 = int_to_ptr.vmem [resolvable:$true] %s32_s22  ;;  %s57_s24 = int_to_ptr.vmem [resolvable:$true] %s56_s24 }
   0x5   :  { %s688_s25 = scalar_lea.vmem %s33_s22, 128  ;;  %p693_p1 = scmp.lt.s32.totalorder %s33_s22, %s33_s22 }
   0x6   :  { %p689_p0 = scmp.ne.s32.totalorder %s33_s22, %s688_s25  ;;  %p694_p2 = scmp.lt.s32.totalorder %s688_s25, %s688_s25 }
   0x8   :  { %p695_p3 = por %p694_p2, %p693_p1 }
   0xa   :  { %p696_p4 = pnand %p695_p3, %p689_p0 }
   0xc   :  { %699 = shalt.err (!%p696_p4)
}
   0xd   :  { %s810_s26 = smov 64   ;;  %s811_s27 = smov 4  }
   0xe   :  { %38 = dma.hbm_to_vmem [thread:$0]  %s937_s1, 128, %s33_s22, [#allocation6], %s810_s26, %s810_s26, %s811_s27  }
   0xf   :  { %s708_s30 = scalar_lea.vmem %s57_s24, 1024  ;;  %p713_p6 = scmp.lt.s32.totalorder %s57_s24, %s57_s24 }
  0x10   :  { %p709_p5 = scmp.ne.s32.totalorder %s57_s24, %s708_s30  ;;  %p714_p7 = scmp.lt.s32.totalorder %s708_s30, %s708_s30 }
  0x12   :  { %p715_p8 = por %p714_p7, %p713_p6 }
  0x14   :  { %p716_p9 = pnand %p715_p8, %p709_p5 }
  0x16   :  { %719 = shalt.err (!%p716_p9)
}
  0x17   :  { %62 = dma.hbm_to_vmem [thread:$0]  %s939_s3, 1024, %s57_s24, [#allocation9], %s810_s26, %s810_s26, %s811_s27  }
  0x18   :  { %s812_s9 = smov [#allocation2]   ;;  %s813_s11 = smov [#allocation7]  }
  0x19   :  { %s20_s10 = sshll.u32 %s812_s9, 4  ;;  %s44_s12 = sshll.u32 %s813_s11, 4  ;;  %s21_s10 = int_to_ptr.vmem [resolvable:$true] %s20_s10  ;;  %s45_s12 = int_to_ptr.vmem [resolvable:$true] %s44_s12 }
  0x1a   :  { %s728_s1 = scalar_lea.vmem %s21_s10, 128  ;;  %p733_p11 = scmp.lt.s32.totalorder %s21_s10, %s21_s10 }
  0x1b   :  { %p729_p10 = scmp.ne.s32.totalorder %s21_s10, %s728_s1  ;;  %p734_p12 = scmp.lt.s32.totalorder %s728_s1, %s728_s1 }
  0x1d   :  { %p735_p13 = por %p734_p12, %p733_p11 }
  0x1f   :  { %p736_p0 = pnand %p735_p13, %p729_p10 }
  0x21   :  { %739 = shalt.err (!%p736_p0)
}
  0x22   :  { %26 = dma.hbm_to_vmem [thread:$0]  %s936_s0, 128, %s21_s10, [#allocation3], %s810_s26, %s810_s26, %s811_s27  }
  0x23   :  { %s748_s3 = scalar_lea.vmem %s45_s12, 1024  ;;  %p753_p2 = scmp.lt.s32.totalorder %s45_s12, %s45_s12 }
  0x24   :  { %p749_p1 = scmp.ne.s32.totalorder %s45_s12, %s748_s3  ;;  %p754_p3 = scmp.lt.s32.totalorder %s748_s3, %s748_s3 }
  0x26   :  { %p755_p4 = por %p754_p3, %p753_p2 }
  0x28   :  { %p756_p5 = pnand %p755_p4, %p749_p1 }
  0x2a   :  { %759 = shalt.err (!%p756_p5)
}
  0x2b   :  { %50 = dma.hbm_to_vmem [thread:$0]  %s938_s2, 1024, %s45_s12, [#allocation6], %s810_s26, %s810_s26, %s811_s27  }
  0x2c   :  { %s814_s17 = smov [#allocation10]  }
  0x2d   :  { %s68_s18 = sshll.u32 %s814_s17, 4  ;;  %s69_s18 = int_to_ptr.vmem [resolvable:$true] %s68_s18 }
  0x2e   :  { %s768_s19 = scalar_lea.vmem %s69_s18, 1024  ;;  %p773_p7 = scmp.lt.s32.totalorder %s69_s18, %s69_s18 }
  0x2f   :  { %p769_p6 = scmp.ne.s32.totalorder %s69_s18, %s768_s19  ;;  %p774_p8 = scmp.lt.s32.totalorder %s768_s19, %s768_s19 }
  0x31   :  { %p775_p9 = por %p774_p8, %p773_p7 }
  0x33   :  { %p776_p10 = pnand %p775_p9, %p769_p6 }
  0x35   :  { %779 = shalt.err (!%p776_p10)
}
  0x36   :  { %74 = dma.hbm_to_vmem [thread:$0]  %s940_s4, 1024, %s69_s18, [#allocation9], %s810_s26, %s810_s26, %s811_s27  }
  0x37   :  { %800 = dma.done.wait [#allocation3], 128  }
  0x38   :  { %801 = vsyncadd [#allocation3], 4294967168 }
  0x39   :  { %802 = dma.done.wait [#allocation6], 1152  }
  0x3a   :  { %803 = vsyncadd [#allocation6], 4294966144 }
  0x3b   :  { %804 = dma.done.wait [#allocation9], 2048  }
  0x3c   :  { %805 = vsyncadd [#allocation9], 4294965248  ;;  %v815_v0 = vmov 0.0   ;;  %vm816_vm0 = vmmov 0   ;;  %vm116_vm1 = vcmask 1044480   ;;  %v655_v2 = vld [vmem:[#allocation2] sm:$0xff]   ;;  %v98_v17 = vlaneseq }
  0x3d   :  { %576 = vmatprep.subr.bf16.mxu0 %v815_v0  ;;  %578 = vmatprep.mubr.msk.bf16.mxu0 %vm816_vm0, %v815_v0  ;;  %v654_v1 = vld [vmem:[#allocation5] sm:$0x1f]   ;;  %vm112_vm2 = vcmask 80896   ;;  %v657_v5 = vld [vmem:[#allocation7 + $0x30] sm:$0xff]   ;;  %v658_v6 = vld [vmem:[#allocation7 + $0x28] sm:$0xff]  }
  0x3e   :  { %582 = vmatprep.subr.bf16.mxu1 %v815_v0  ;;  %598 = vmatprep.mubr.msk.bf16.mxu1 %vm816_vm0, %v815_v0  ;;  %v118_v3 = vsel %vm116_vm1, %v654_v1, 0  ;;  %v656_v4 = vld [vmem:[#allocation7 + $0x38] sm:$0xff]   ;;  %v659_v7 = vld [vmem:[#allocation7 + $0x20] sm:$0xff]   ;;  %v661_v9 = vld [vmem:[#allocation7 + $0x10] sm:$0xff]   ;;  %v907_v18 = vshrl.u32 %v98_v17, 7 }
  0x3f   :  { %577 = vmatpush3.bf16.msra.mxu0 %v118_v3  ;;  %583 = vmatpush3.bf16.msra.mxu1 %v656_v4  ;;  %v660_v8 = vld [vmem:[#allocation7 + $0x18] sm:$0xff]   ;;  %v662_v10 = vld [vmem:[#allocation7 + $0x8] sm:$0xff]   ;;  %v663_v11 = vld [vmem:[#allocation7] sm:$0xff]  }
  0x40   :  { %602 = vmatprep.subr.bf16.mxu0 %v815_v0  ;;  %584 = vmatprep.subr.bf16.mxu1 %v815_v0  ;;  %v664_v12 = vld [vmem:[#allocation8 + $0x38] sm:$0xff]   ;;  %v665_v13 = vld [vmem:[#allocation8 + $0x30] sm:$0xff]   ;;  %v666_v14 = vld [vmem:[#allocation8 + $0x28] sm:$0xff]   ;;  %v100_v19 = vsub.s32 0, %v907_v18  ;;  %v182_v39 = vsub.s32 1, %v907_v18  ;;  %v294_v53 = vsub.s32 2, %v907_v18 }
  0x41   :  { %v667_v15 = vld [vmem:[#allocation8 + $0x20] sm:$0xff]   ;;  %v668_v16 = vld [vmem:[#allocation8 + $0x18] sm:$0xff]   ;;  %v913_v20 = vld [vmem:[%s941_s5] sm:$0xf]  ;;  %v406_v1 = vsub.s32 3, %v907_v18  ;;  %s817_s5 = smov [#allocation11]  }
  0x42   :  { %579 = vmatmul.mubr.msk.bf16.vlgmr.msra.gmra.mxu0 %vm112_vm2, %v655_v2  ;;  %v101_v21 = vrot.slane %v913_v20, %v100_v19  ;;  %v669_v31 = vld [vmem:[#allocation8 + $0x10] sm:$0xff]   ;;  %v670_v32 = vld [vmem:[#allocation8 + $0x8] sm:$0xff]   ;;  %v671_v33 = vld [vmem:[#allocation8] sm:$0xff]   ;;  %v183_v40 = vrot.slane %v913_v20, %v182_v39  ;;  %v295_v54 = vrot.slane %v913_v20, %v294_v53  ;;  %s506_s21 = sshll.u32 %s817_s5, 4  ;;  %s507_s21 = int_to_ptr.vmem [resolvable:$true] %s506_s21 }
  0x43   :  { %618 = vmatprep.mubr.msk.bf16.mxu0 %vm816_vm0, %v815_v0  ;;  %585 = vmatpush3.bf16.msra.mxu1 %v657_v5  ;;  %v672_v34 = vld [vmem:[#allocation10 + $0x38] sm:$0xff]   ;;  %v673_v35 = vld [vmem:[#allocation10 + $0x30] sm:$0xff]   ;;  %v674_v36 = vld [vmem:[#allocation10 + $0x28] sm:$0xff]   ;;  %s780_s22 = scalar_lea.vmem %s507_s21, 256  ;;  %p785_p12 = scmp.lt.s32.totalorder %s507_s21, %s507_s21 }
  0x44   :  { %586 = vmatprep.subr.bf16.mxu1 %v815_v0  ;;  %603 = vmatpush3.bf16.msra.mxu0 %v664_v12  ;;  %v675_v37 = vld [vmem:[#allocation10 + $0x20] sm:$0xff]   ;;  %v676_v38 = vld [vmem:[#allocation10 + $0x18] sm:$0xff]   ;;  %v677_v50 = vld [vmem:[#allocation10 + $0x10] sm:$0xff]   ;;  %p781_p11 = scmp.ne.s32.totalorder %s507_s21, %s780_s22  ;;  %p786_p13 = scmp.lt.s32.totalorder %s780_s22, %s780_s22 }
  0x45   :  { %604 = vmatprep.subr.bf16.mxu0 %v815_v0  ;;  %v678_v51 = vld [vmem:[#allocation10 + $0x8] sm:$0xff]   ;;  %v679_v52 = vld [vmem:[#allocation10] sm:$0xff]  }
  0x46   :  { %p787_p0 = por %p786_p13, %p785_p12 }
  0x47   :  { %587 = vmatpush3.bf16.msra.mxu1 %v658_v6 }
  0x48   :  { %588 = vmatprep.subr.bf16.mxu1 %v815_v0  ;;  %605 = vmatpush3.bf16.msra.mxu0 %v665_v13  ;;  %p788_p1 = pnand %p787_p0, %p781_p11 }
  0x49   :  { %606 = vmatprep.subr.bf16.mxu0 %v815_v0 }
  0x4b   :  { %589 = vmatpush3.bf16.msra.mxu1 %v659_v7 }
  0x4c   :  { %590 = vmatprep.subr.bf16.mxu1 %v815_v0  ;;  %607 = vmatpush3.bf16.msra.mxu0 %v666_v14 }
  0x4d   :  { %608 = vmatprep.subr.bf16.mxu0 %v815_v0 }
  0x4f   :  { %591 = vmatpush3.bf16.msra.mxu1 %v660_v8 }
  0x50   :  { %592 = vmatprep.subr.bf16.mxu1 %v815_v0  ;;  %609 = vmatpush3.bf16.msra.mxu0 %v667_v15 }
  0x51   :  { %610 = vmatprep.subr.bf16.mxu0 %v815_v0 }
  0x53   :  { %593 = vmatpush3.bf16.msra.mxu1 %v661_v9 }
  0x54   :  { %594 = vmatprep.subr.bf16.mxu1 %v815_v0  ;;  %611 = vmatpush3.bf16.msra.mxu0 %v668_v16 }
  0x55   :  { %612 = vmatprep.subr.bf16.mxu0 %v815_v0 }
  0x57   :  { %595 = vmatpush3.bf16.msra.mxu1 %v662_v10 }
  0x58   :  { %596 = vmatprep.subr.bf16.mxu1 %v815_v0  ;;  %613 = vmatpush3.bf16.msra.mxu0 %v669_v31 }
  0x59   :  { %614 = vmatprep.subr.bf16.mxu0 %v815_v0 }
  0x5b   :  { %597 = vmatpush3.bf16.msra.mxu1 %v663_v11 }
  0x5c   :  { %622 = vmatprep.subr.bf16.mxu1 %v815_v0  ;;  %615 = vmatpush3.bf16.msra.mxu0 %v670_v32 }
  0x5d   :  { %616 = vmatprep.subr.bf16.mxu0 %v815_v0 }
  0x60   :  { %617 = vmatpush3.bf16.msra.mxu0 %v671_v33 }
 0x102   :  { %v154_v22 = vpop.f32.mrf.mxu0 }
 0x103   :  { %v155_v24 = vadd.f32 %v154_v22, %v101_v21 }
 0x104   :  { %v580_v23 = vpop.f32.mrf.mxu0 }
 0x105   :  { %v161_v28 = vmax.f32 %v155_v24, 0.0 }
 0x106   :  { %v157_v25 = vpop.f32.mrf.mxu0 }
 0x107   :  { %v158_v26 = vadd.f32 %v157_v25, %v101_v21 }
 0x108   :  { %v581_v27 = vpop.f32.mrf.mxu0 }
 0x109   :  { %v162_v29 = vmax.f32 %v158_v26, 0.0 }
 0x10b   :  { %v163_v30 = vpack.c.bf16 %v162_v29, %v161_v28 }
 0x10d   :  { %599 = vmatmul.mubr.bf16.vlgmr.msra.gmra.mxu1 %v163_v30 }
 0x10e   :  { %638 = vmatprep.mubr.msk.bf16.mxu1 %vm816_vm0, %v815_v0  ;;  %623 = vmatpush3.bf16.msra.mxu1 %v672_v34 }
 0x10f   :  { %624 = vmatprep.subr.bf16.mxu1 %v815_v0 }
 0x112   :  { %625 = vmatpush3.bf16.msra.mxu1 %v673_v35 }
 0x113   :  { %626 = vmatprep.subr.bf16.mxu1 %v815_v0 }
 0x116   :  { %627 = vmatpush3.bf16.msra.mxu1 %v674_v36 }
 0x117   :  { %628 = vmatprep.subr.bf16.mxu1 %v815_v0 }
 0x11a   :  { %629 = vmatpush3.bf16.msra.mxu1 %v675_v37 }
 0x11b   :  { %630 = vmatprep.subr.bf16.mxu1 %v815_v0 }
 0x11e   :  { %631 = vmatpush3.bf16.msra.mxu1 %v676_v38 }
 0x11f   :  { %632 = vmatprep.subr.bf16.mxu1 %v815_v0 }
 0x122   :  { %633 = vmatpush3.bf16.msra.mxu1 %v677_v50 }
 0x123   :  { %634 = vmatprep.subr.bf16.mxu1 %v815_v0 }
 0x126   :  { %635 = vmatpush3.bf16.msra.mxu1 %v678_v51 }
 0x127   :  { %636 = vmatprep.subr.bf16.mxu1 %v815_v0  ;;  %v407_v0 = vrot.slane %v913_v20, %v406_v1 }
 0x12a   :  { %637 = vmatpush3.bf16.msra.mxu1 %v679_v52 }
 0x1cd   :  { %v266_v41 = vpop.f32.mrf.mxu1 }
 0x1ce   :  { %v267_v43 = vadd.f32 %v266_v41, %v183_v40 }
 0x1cf   :  { %v600_v42 = vpop.f32.mrf.mxu1 }
 0x1d0   :  { %v273_v47 = vmax.f32 %v267_v43, 0.0 }
 0x1d1   :  { %v269_v44 = vpop.f32.mrf.mxu1 }
 0x1d2   :  { %v270_v45 = vadd.f32 %v269_v44, %v183_v40 }
 0x1d3   :  { %v601_v46 = vpop.f32.mrf.mxu1 }
 0x1d4   :  { %v274_v48 = vmax.f32 %v270_v45, 0.0 }
 0x1d6   :  { %v275_v49 = vpack.c.bf16 %v274_v48, %v273_v47 }
 0x1d8   :  { %619 = vmatmul.mubr.bf16.vlgmr.msra.gmra.mxu0 %v275_v49 }
 0x298   :  { %v378_v55 = vpop.f32.mrf.mxu0 }
 0x299   :  { %v379_v57 = vadd.f32 %v378_v55, %v295_v54 }
 0x29a   :  { %v620_v56 = vpop.f32.mrf.mxu0 }
 0x29b   :  { %v385_v61 = vmax.f32 %v379_v57, 0.0 }
 0x29c   :  { %v381_v58 = vpop.f32.mrf.mxu0 }
 0x29d   :  { %v382_v59 = vadd.f32 %v381_v58, %v295_v54 }
 0x29e   :  { %v621_v60 = vpop.f32.mrf.mxu0 }
 0x29f   :  { %v386_v62 = vmax.f32 %v382_v59, 0.0 }
 0x2a1   :  { %v387_v63 = vpack.c.bf16 %v386_v62, %v385_v61 }
 0x2a3   :  { %639 = vmatmul.mubr.bf16.vlgmr.msra.gmra.mxu1 %v387_v63 }
 0x363   :  { %v490_v2 = vpop.f32.mrf.mxu1 }
 0x364   :  { %v491_v3 = vadd.f32 %v490_v2, %v407_v0 }
 0x365   :  { %v640_v4 = vpop.f32.mrf.mxu1 }
 0x366   :  { %v497_v5 = vmax.f32 %v491_v3, 0.0 }
 0x367   :  { %v493_v6 = vpop.f32.mrf.mxu1 }
 0x368   :  { %499 = vst [vmem:[#allocation11] sm:$0xff] %v497_v5  ;;  %v494_v7 = vadd.f32 %v493_v6, %v407_v0 }
 0x369   :  { %v641_v8 = vpop.f32.mrf.mxu1 }
 0x36a   :  { %v498_v9 = vmax.f32 %v494_v7, 0.0 }
 0x36c   :  { %500 = vst [vmem:[#allocation11 + $0x8] sm:$0xff] %v498_v9 }
 0x36d   :  { %791 = shalt.err (!%p788_p1)
}
 0x36e   :  { %s818_s23 = smov 128   ;;  %s819_s24 = smov 8  }
 0x36f   :  { %512 = dma.vmem_to_hbm [thread:$0]  %s507_s21, 256, %s942_s6, [#allocation4], %s818_s23, %s818_s23, %s819_s24  }
 0x370   :  { %806 = dma.done.wait [#allocation4], 256  }
 0x371   :  { %807 = vsyncadd [#allocation4], 4294967040 }
 0x372   :  { %516 = vsyncpa [#allocation3], 1 }
 0x373   :  { %517 = vsyncpa [#allocation6], 1 }
 0x374   :  { %518 = vsyncpa [#allocation9], 1 }
 0x375   :  { %519 = vsyncpa [#allocation4], 1 }

</bundles_post_ra>
